<compile_context>
chip_gen: v7x
topology: tpu7x:2x2x1
jax: 0.10.0
libtpu: 0.0.40
codegen_flags: <defaults>
</compile_context>

<pallas_src>
import functools
import numpy as np
import jax
import jax.numpy as jnp
from jax.experimental import pallas as pl
from jax.experimental.pallas import tpu as pltpu

LANES = 128
GRID = 7
CELLS_PAD = 64          # 7x7 grid padded to 8x8 per image -> pure bit-op decode


def _round_up(x, m):
    return ((x + m - 1) // m) * m


def _objloss_kernel(pred_ref, lab_ref, out_ref, state_ref, *,
                    n_batch, num_cells_pad, inv_grid, num_ch, tile_s):
    s_idx = pl.program_id(0)

    @pl.when(s_idx == 0)
    def _init():
        state_ref[0] = 0.0        # order-independent running total
        state_ref[1] = 0.0        # running noobj_confi_loss prefix
        state_ref[2] = 0.0        # running obj_conf_loss value

    # ---- per-cell index decode: pure int/VPU bit ops (exact, no EUP) ----
    row = jax.lax.broadcasted_iota(jnp.int32, (tile_s, LANES), 0) + s_idx * tile_s
    col = jax.lax.broadcasted_iota(jnp.int32, (tile_s, LANES), 1)
    t = row * LANES + col            # global flat cell index = img*64 + m*8 + n
    img = t >> 6
    j = t & 63
    m_i = j >> 3                     # H index -> x offset
    n_i = j & 7                      # W index -> y offset
    valid = (t < num_cells_pad) & (m_i < 7) & (n_i < 7)
    m = m_i.astype(jnp.float32)
    n = n_i.astype(jnp.float32)
    # Reference iteration order key (i, n, m lexicographic; m fastest).
    # f32 key is exact for < 2^24 padded cells (N < ~262k images).
    t_ord = (img * 64 + n_i * 8 + m_i).astype(jnp.float32)

    pb1 = pred_ref[0:4]              # predicted box 1: x, y, w, h
    pb2 = pred_ref[5:9]              # predicted box 2: x, y, w, h
    gtb = lab_ref[0:4]               # label box channels 0:4
    gtb2 = lab_ref[5:9]              # label box channels 5:9
    p4 = pred_ref[4]
    p9 = pred_ref[9]
    l4 = lab_ref[4]

    def corners(b):
        xc = (b[0] + m) * inv_grid
        yc = (b[1] + n) * inv_grid
        hw = 0.5 * b[2]
        hh = 0.5 * b[3]
        return xc - hw, yc - hh, xc + hw, yc + hh

    box1 = corners(pb1)
    box2 = corners(pb2)
    gt = corners(gtb)

    def inter_union(b, g):
        iw = jnp.maximum(jnp.minimum(b[2], g[2]) - jnp.maximum(b[0], g[0]), 0.0)
        ih = jnp.maximum(jnp.minimum(b[3], g[3]) - jnp.maximum(b[1], g[1]), 0.0)
        ai = iw * ih
        a1 = (b[2] - b[0]) * (b[3] - b[1])
        a2 = (g[2] - g[0]) * (g[3] - g[1])
        return ai, a1 + a2 - ai

    ai1, u1 = inter_union(box1, gt)
    ai2, u2 = inter_union(box2, gt)
    # IoU values via approx reciprocal (EUP-cheap); the responsible-box
    # decision below is division-free so it cannot be perturbed by it.
    iou1 = jnp.where(ai1 > 0.0, ai1 * pl.reciprocal(u1, approx=True), 0.0)
    iou2 = jnp.where(ai2 > 0.0, ai2 * pl.reciprocal(u2, approx=True), 0.0)

    is_obj = (l4 == 1.0) & valid
    ge = ai1 * u2 >= ai2 * u1        # == (iou1 >= iou2) exactly, no divides
    sel1 = is_obj & ge
    sel2 = is_obj & jnp.logical_not(ge)

    # Localization loss of the responsible box.
    dxy1 = pb1[0:2] - gtb[0:2]
    dwh1 = jnp.sqrt(pb1[2:4]) - jnp.sqrt(gtb[2:4])
    obj1 = 5.0 * jnp.sum(dxy1 * dxy1 + dwh1 * dwh1, axis=0)
    dxy2 = pb2[0:2] - gtb2[0:2]
    dwh2 = jnp.sqrt(pb2[2:4]) - jnp.sqrt(gtb2[2:4])
    obj2 = 5.0 * jnp.sum(dxy2 * dxy2 + dwh2 * dwh2, axis=0)

    # Classification loss.
    if num_ch > 10:
        cdiff = pred_ref[10:num_ch] - lab_ref[10:num_ch]
        cls_cell = jnp.sum(cdiff * cdiff, axis=0)
    else:
        cls_cell = jnp.zeros((tile_s, LANES), jnp.float32)

    # Confidence terms.
    c1 = (p4 - iou1) ** 2
    c2 = (p9 - iou2) ** 2
    noobj_cell = jnp.where(
        is_obj,
        jnp.where(ge, 0.5 * c2, 0.5 * c1),
        jnp.where(valid, 0.5 * (p4 * p4 + p9 * p9), 0.0))

    order_indep = (jnp.where(sel1, obj1, 0.0) + jnp.where(sel2, obj2, 0.0)
                   + noobj_cell + jnp.where(is_obj, cls_cell, 0.0))

    # Sequential obj_conf_loss carry (reference overwrite quirk): within the
    # tile find the LAST iou1>=iou2 cell; obj_conf becomes the noobj prefix up
    # to that cell plus its c1, plus c2 of later sel2 cells.  Tiles cover
    # whole images, so tile order == reference order and the SMEM carry is
    # exact across tiles.
    t_loc = jnp.max(jnp.where(sel1, t_ord, -1.0))
    has_sel1 = t_loc >= 0.0
    prefix_noobj = jnp.sum(jnp.where(t_ord < t_loc, noobj_cell, 0.0))
    c1_star = jnp.sum(jnp.where(t_ord == t_loc, c1, 0.0))
    c2_tail = jnp.sum(jnp.where(sel2 & (t_ord > t_loc), c2, 0.0))

    total_in = state_ref[0]
    noobj_in = state_ref[1]
    conf_in = state_ref[2]

    total_out = total_in + jnp.sum(order_indep)
    noobj_out = noobj_in + jnp.sum(noobj_cell)
    conf_out = (jnp.where(has_sel1, noobj_in + prefix_noobj, conf_in)
                + c1_star + c2_tail)

    state_ref[0] = total_out
    state_ref[1] = noobj_out
    state_ref[2] = conf_out

    out_ref[0] = (total_out + conf_out) / float(n_batch)


@functools.partial(jax.jit, static_argnames=("tile_s",))
def objloss_pallas(pred, labels, tile_s=128):
    N, C, H, W = pred.shape
    assert (H, W) == (GRID, GRID) and labels.shape == pred.shape and C >= 10
    num_cells_pad = N * CELLS_PAD
    s0 = _round_up(pl.cdiv(num_cells_pad, LANES), 8)
    ts = min(tile_s, s0)
    s_total = _round_up(s0, ts)
    n_tiles = s_total // ts

    def to_cells(x):
        x = x.astype(jnp.float32)
        # Pad the 7x7 grid to 8x8 so every image occupies exactly 64 lanes:
        # the in-kernel decode becomes pure shifts/ands and every grid tile
        # covers whole images (required by the sequential obj_conf carry).
        x = jnp.pad(x, ((0, 0), (0, 0), (0, 8 - GRID), (0, 8 - GRID)))
        x = jnp.transpose(x.reshape(N, C, CELLS_PAD), (1, 0, 2))
        x = x.reshape(C, num_cells_pad)
        x = jnp.pad(x, ((0, 0), (0, s_total * LANES - num_cells_pad)))
        return x.reshape(C, s_total, LANES)

    p_cells = to_cells(pred)
    l_cells = to_cells(labels)

    kernel = functools.partial(
        _objloss_kernel, n_batch=N, num_cells_pad=num_cells_pad,
        inv_grid=1.0 / float(H), num_ch=C, tile_s=ts)

    bytes_in = 2 * C * s_total * LANES * 4
    out = pl.pallas_call(
        kernel,
        out_shape=jax.ShapeDtypeStruct((1,), jnp.float32),
        grid=(n_tiles,),
        in_specs=[pl.BlockSpec((C, ts, LANES), lambda s: (0, s, 0)),
                  pl.BlockSpec((C, ts, LANES), lambda s: (0, s, 0))],
        out_specs=pl.BlockSpec((1,), lambda s: (0,),
                               memory_space=pltpu.MemorySpace.SMEM),
        scratch_shapes=[pltpu.SMEM((4,), jnp.float32)],
        compiler_params=pltpu.CompilerParams(
            dimension_semantics=("arbitrary",)),
        cost_estimate=pl.CostEstimate(
            flops=200 * s_total * LANES,
            transcendentals=10 * s_total * LANES,
            bytes_accessed=bytes_in + 4),
    )(p_cells, l_cells)
    return out[0]


# --- pure numpy reference mirroring the PyTorch code exactly -----------------
def _iou_ref(b1, b2):
    ib = [0.0, 0.0, 0.0, 0.0]
    if b1[2] < b2[0] or b1[0] > b2[2] or b1[3] < b2[1] or b1[1] > b2[3]:
        pass
    else:
        ib = [max(b1[0], b2[0]), max(b1[1], b2[1]),
              min(b1[2], b2[2]), min(b1[3], b2[3])]
    a1 = (b1[2] - b1[0]) * (b1[3] - b1[1])
    a2 = (b2[2] - b2[0]) * (b2[3] - b2[1])
    ai = (ib[2] - ib[0]) * (ib[3] - ib[1])
    if ai > 0:
        return ai / (a1 + a2 - ai)
    return 0.0


def objloss_ref(pred, labels):
    pred = np.asarray(pred, np.float64)
    labels = np.asarray(labels, np.float64)
    ngx, ngy = labels.shape[-2:]
    noobj = 0.0
    obj_loss = 0.0
    nb = labels.shape[0]
    class_loss = 0.0
    obj_conf = 0.0
    for i in range(nb):
        for n in range(7):
            for m in range(7):
                if labels[i, 4, m, n] == 1:
                    b1 = ((pred[i, 0, m, n] + m) / ngx - pred[i, 2, m, n] / 2,
                          (pred[i, 1, m, n] + n) / ngy - pred[i, 3, m, n] / 2,
                          (pred[i, 0, m, n] + m) / ngx + pred[i, 2, m, n] / 2,
                          (pred[i, 1, m, n] + n) / ngy + pred[i, 3, m, n] / 2)
                    b2 = ((pred[i, 5, m, n] + m) / ngx - pred[i, 7, m, n] / 2,
                          (pred[i, 6, m, n] + n) / ngy - pred[i, 8, m, n] / 2,
                          (pred[i, 5, m, n] + m) / ngx + pred[i, 7, m, n] / 2,
                          (pred[i, 6, m, n] + n) / ngy + pred[i, 8, m, n] / 2)
                    gt = ((labels[i, 0, m, n] + m) / ngx - labels[i, 2, m, n] / 2,
                          (labels[i, 1, m, n] + n) / ngy - labels[i, 3, m, n] / 2,
                          (labels[i, 0, m, n] + m) / ngx + labels[i, 2, m, n] / 2,
                          (labels[i, 1, m, n] + n) / ngy + labels[i, 3, m, n] / 2)
                    iou1 = _iou_ref(b1, gt)
                    iou2 = _iou_ref(b2, gt)
                    if iou1 >= iou2:
                        obj_loss += 5 * (np.sum((pred[i, 0:2, m, n] - labels[i, 0:2, m, n]) ** 2)
                                         + np.sum((np.sqrt(pred[i, 2:4, m, n])
                                                   - np.sqrt(labels[i, 2:4, m, n])) ** 2))
                        obj_conf = noobj + (pred[i, 4, m, n] - iou1) ** 2
                        noobj = noobj + 0.5 * (pred[i, 9, m, n] - iou2) ** 2
                    else:
                        obj_loss += 5 * (np.sum((pred[i, 5:7, m, n] - labels[i, 5:7, m, n]) ** 2)
                                         + np.sum((np.sqrt(pred[i, 7:9, m, n])
                                                   - np.sqrt(labels[i, 7:9, m, n])) ** 2))
                        obj_conf = obj_conf + (pred[i, 9, m, n] - iou2) ** 2
                        noobj = noobj + 0.5 * (pred[i, 4, m, n] - iou1) ** 2
                    class_loss += np.sum((pred[i, 10:, m, n] - labels[i, 10:, m, n]) ** 2)
                else:
                    noobj += 0.5 * np.sum(pred[i, [4, 9], m, n] ** 2)
    return (obj_loss + obj_conf + noobj + class_loss) / nb


if __name__ == "__main__":
    key = jax.random.PRNGKey(0)
    k1, k2, k3, k4, k5, k6 = jax.random.split(key, 6)
    C = 14   # 10 box/conf channels + 4 classes, 7x7 grid (YOLOv1-style)

    # Small case: single tile.
    N = 2
    pred = jax.random.uniform(k1, (N, C, GRID, GRID), jnp.float32, 0.05, 1.0)
    labels = jax.random.uniform(k2, (N, C, GRID, GRID), jnp.float32, 0.05, 1.0)
    conf = (jax.random.uniform(k3, (N, GRID, GRID)) > 0.6).astype(jnp.float32)
    labels = labels.at[:, 4, :, :].set(conf)   # objectness channel: exactly 0/1
    loss = jax.block_until_ready(objloss_pallas(pred, labels))
    ref = objloss_ref(pred, labels)
    np.testing.assert_allclose(float(loss), float(ref), rtol=5e-3, atol=1e-3)

    # Larger case with a small tile: exercises the multi-tile sequential carry.
    N2 = 32
    pred2 = jax.random.uniform(k4, (N2, C, GRID, GRID), jnp.float32, 0.05, 1.0)
    labels2 = jax.random.uniform(k5, (N2, C, GRID, GRID), jnp.float32, 0.05, 1.0)
    conf2 = (jax.random.uniform(k6, (N2, GRID, GRID)) > 0.6).astype(jnp.float32)
    labels2 = labels2.at[:, 4, :, :].set(conf2)
    loss2 = jax.block_until_ready(objloss_pallas(pred2, labels2, tile_s=8))
    ref2 = objloss_ref(pred2, labels2)
    np.testing.assert_allclose(float(loss2), float(ref2), rtol=5e-3, atol=1e-3)

    print("KERNEL_OK")
</pallas_src>

<mosaic_0001>
module attributes {stable_mosaic.version = 11 : i64} {
  func.func @_objloss_kernel(%arg0: i32, %arg1: memref<14x8x128xf32, #tpu.memory_space<vmem>>, %arg2: memref<14x8x128xf32, #tpu.memory_space<vmem>>, %arg3: memref<1xf32, #tpu.memory_space<smem>>, %arg4: memref<4xf32, #tpu.memory_space<smem>>) attributes {dimension_semantics = [#tpu.dimension_semantics<arbitrary>], iteration_bounds = array<i64: 1>, scalar_prefetch = 0 : i64, scratch_operands = 1 : i64, tpu.core_type = #tpu.core_type<tc>, window_params = [{transform_indices = @transform_0, window_bounds = array<i64: 14, 8, 128>}, {transform_indices = @transform_1, window_bounds = array<i64: 14, 8, 128>}, {transform_indices = @transform_2, window_bounds = array<i64: 1>}]} {
    %c0_i32 = arith.constant 0 : i32
    %0 = arith.cmpi eq, %arg0, %c0_i32 : i32
    %1 = arith.extui %0 : i1 to i32
    %c0_i32_0 = arith.constant 0 : i32
    %2 = arith.cmpi ne, %1, %c0_i32_0 : i32
    scf.if %2 {
      %cst_77 = arith.constant 0.000000e+00 : f32
      %c0_78 = arith.constant 0 : index
      %285 = memref.load %arg4[%c0_78] : memref<4xf32, #tpu.memory_space<smem>>
      memref.store %cst_77, %arg4[%c0_78] : memref<4xf32, #tpu.memory_space<smem>>
      %cst_79 = arith.constant 0.000000e+00 : f32
      %c1_80 = arith.constant 1 : index
      %286 = memref.load %arg4[%c1_80] : memref<4xf32, #tpu.memory_space<smem>>
      memref.store %cst_79, %arg4[%c1_80] : memref<4xf32, #tpu.memory_space<smem>>
      %cst_81 = arith.constant 0.000000e+00 : f32
      %c2_82 = arith.constant 2 : index
      %287 = memref.load %arg4[%c2_82] : memref<4xf32, #tpu.memory_space<smem>>
      memref.store %cst_81, %arg4[%c2_82] : memref<4xf32, #tpu.memory_space<smem>>
    } else {
    }
    %3 = tpu.iota {dimensions = array<i32: 0>} : vector<8x128xi32>
    %c8_i32 = arith.constant 8 : i32
    %4 = arith.muli %arg0, %c8_i32 : i32
    %5 = vector.broadcast %4 : i32 to vector<8x128xi32>
    %6 = arith.addi %3, %5 : vector<8x128xi32>
    %7 = tpu.iota {dimensions = array<i32: 1>} : vector<8x128xi32>
    %c128_i32 = arith.constant 128 : i32
    %8 = vector.broadcast %c128_i32 : i32 to vector<8x128xi32>
    %9 = arith.muli %6, %8 : vector<8x128xi32>
    %10 = arith.addi %9, %7 : vector<8x128xi32>
    %c6_i32 = arith.constant 6 : i32
    %11 = vector.broadcast %c6_i32 : i32 to vector<8x128xi32>
    %12 = arith.shrsi %10, %11 : vector<8x128xi32>
    %c63_i32 = arith.constant 63 : i32
    %13 = vector.broadcast %c63_i32 : i32 to vector<8x128xi32>
    %14 = arith.andi %10, %13 : vector<8x128xi32>
    %c3_i32 = arith.constant 3 : i32
    %15 = vector.broadcast %c3_i32 : i32 to vector<8x128xi32>
    %16 = arith.shrsi %14, %15 : vector<8x128xi32>
    %c7_i32 = arith.constant 7 : i32
    %17 = vector.broadcast %c7_i32 : i32 to vector<8x128xi32>
    %18 = arith.andi %14, %17 : vector<8x128xi32>
    %c128_i32_1 = arith.constant 128 : i32
    %19 = vector.broadcast %c128_i32_1 : i32 to vector<8x128xi32>
    %20 = arith.cmpi slt, %10, %19 : vector<8x128xi32>
    %c7_i32_2 = arith.constant 7 : i32
    %21 = vector.broadcast %c7_i32_2 : i32 to vector<8x128xi32>
    %22 = arith.cmpi slt, %16, %21 : vector<8x128xi32>
    %23 = arith.andi %20, %22 : vector<8x128xi1>
    %c7_i32_3 = arith.constant 7 : i32
    %24 = vector.broadcast %c7_i32_3 : i32 to vector<8x128xi32>
    %25 = arith.cmpi slt, %18, %24 : vector<8x128xi32>
    %26 = arith.andi %23, %25 : vector<8x128xi1>
    %27 = arith.sitofp %16 : vector<8x128xi32> to vector<8x128xf32>
    %28 = arith.sitofp %18 : vector<8x128xi32> to vector<8x128xf32>
    %c64_i32 = arith.constant 64 : i32
    %29 = vector.broadcast %c64_i32 : i32 to vector<8x128xi32>
    %30 = arith.muli %12, %29 : vector<8x128xi32>
    %c8_i32_4 = arith.constant 8 : i32
    %31 = vector.broadcast %c8_i32_4 : i32 to vector<8x128xi32>
    %32 = arith.muli %18, %31 : vector<8x128xi32>
    %33 = arith.addi %30, %32 : vector<8x128xi32>
    %34 = arith.addi %33, %16 : vector<8x128xi32>
    %35 = arith.sitofp %34 : vector<8x128xi32> to vector<8x128xf32>
    %c0 = arith.constant 0 : index
    %c0_5 = arith.constant 0 : index
    %c0_6 = arith.constant 0 : index
    %36 = vector.load %arg1[%c0, %c0_5, %c0_6] : memref<14x8x128xf32, #tpu.memory_space<vmem>>, vector<4x8x128xf32>
    %c5 = arith.constant 5 : index
    %c0_7 = arith.constant 0 : index
    %c0_8 = arith.constant 0 : index
    %37 = vector.load %arg1[%c5, %c0_7, %c0_8] : memref<14x8x128xf32, #tpu.memory_space<vmem>>, vector<4x8x128xf32>
    %c0_9 = arith.constant 0 : index
    %c0_10 = arith.constant 0 : index
    %c0_11 = arith.constant 0 : index
    %38 = vector.load %arg2[%c0_9, %c0_10, %c0_11] : memref<14x8x128xf32, #tpu.memory_space<vmem>>, vector<4x8x128xf32>
    %c5_12 = arith.constant 5 : index
    %c0_13 = arith.constant 0 : index
    %c0_14 = arith.constant 0 : index
    %39 = vector.load %arg2[%c5_12, %c0_13, %c0_14] : memref<14x8x128xf32, #tpu.memory_space<vmem>>, vector<4x8x128xf32>
    %c4 = arith.constant 4 : index
    %c0_15 = arith.constant 0 : index
    %c0_16 = arith.constant 0 : index
    %40 = vector.load %arg1[%c4, %c0_15, %c0_16] : memref<14x8x128xf32, #tpu.memory_space<vmem>>, vector<1x8x128xf32>
    %41 = vector.shape_cast %40 : vector<1x8x128xf32> to vector<8x128xf32>
    %c9 = arith.constant 9 : index
    %c0_17 = arith.constant 0 : index
    %c0_18 = arith.constant 0 : index
    %42 = vector.load %arg1[%c9, %c0_17, %c0_18] : memref<14x8x128xf32, #tpu.memory_space<vmem>>, vector<1x8x128xf32>
    %43 = vector.shape_cast %42 : vector<1x8x128xf32> to vector<8x128xf32>
    %c4_19 = arith.constant 4 : index
    %c0_20 = arith.constant 0 : index
    %c0_21 = arith.constant 0 : index
    %44 = vector.load %arg2[%c4_19, %c0_20, %c0_21] : memref<14x8x128xf32, #tpu.memory_space<vmem>>, vector<1x8x128xf32>
    %45 = vector.shape_cast %44 : vector<1x8x128xf32> to vector<8x128xf32>
    %46 = vector.extract_strided_slice %36 {offsets = [0, 0, 0], sizes = [1, 8, 128], strides = [1, 1, 1]} : vector<4x8x128xf32> to vector<1x8x128xf32>
    %47 = vector.shape_cast %46 : vector<1x8x128xf32> to vector<8x128xf32>
    %48 = arith.addf %47, %27 : vector<8x128xf32>
    %cst = arith.constant 0.142857149 : f32
    %49 = vector.broadcast %cst : f32 to vector<8x128xf32>
    %50 = arith.mulf %48, %49 : vector<8x128xf32>
    %51 = vector.extract_strided_slice %36 {offsets = [1, 0, 0], sizes = [1, 8, 128], strides = [1, 1, 1]} : vector<4x8x128xf32> to vector<1x8x128xf32>
    %52 = vector.shape_cast %51 : vector<1x8x128xf32> to vector<8x128xf32>
    %53 = arith.addf %52, %28 : vector<8x128xf32>
    %cst_22 = arith.constant 0.142857149 : f32
    %54 = vector.broadcast %cst_22 : f32 to vector<8x128xf32>
    %55 = arith.mulf %53, %54 : vector<8x128xf32>
    %56 = vector.extract_strided_slice %36 {offsets = [2, 0, 0], sizes = [1, 8, 128], strides = [1, 1, 1]} : vector<4x8x128xf32> to vector<1x8x128xf32>
    %57 = vector.shape_cast %56 : vector<1x8x128xf32> to vector<8x128xf32>
    %cst_23 = arith.constant 5.000000e-01 : f32
    %58 = vector.broadcast %cst_23 : f32 to vector<8x128xf32>
    %59 = arith.mulf %58, %57 : vector<8x128xf32>
    %60 = vector.extract_strided_slice %36 {offsets = [3, 0, 0], sizes = [1, 8, 128], strides = [1, 1, 1]} : vector<4x8x128xf32> to vector<1x8x128xf32>
    %61 = vector.shape_cast %60 : vector<1x8x128xf32> to vector<8x128xf32>
    %cst_24 = arith.constant 5.000000e-01 : f32
    %62 = vector.broadcast %cst_24 : f32 to vector<8x128xf32>
    %63 = arith.mulf %62, %61 : vector<8x128xf32>
    %64 = arith.subf %50, %59 : vector<8x128xf32>
    %65 = arith.subf %55, %63 : vector<8x128xf32>
    %66 = arith.addf %50, %59 : vector<8x128xf32>
    %67 = arith.addf %55, %63 : vector<8x128xf32>
    %68 = vector.extract_strided_slice %37 {offsets = [0, 0, 0], sizes = [1, 8, 128], strides = [1, 1, 1]} : vector<4x8x128xf32> to vector<1x8x128xf32>
    %69 = vector.shape_cast %68 : vector<1x8x128xf32> to vector<8x128xf32>
    %70 = arith.addf %69, %27 : vector<8x128xf32>
    %cst_25 = arith.constant 0.142857149 : f32
    %71 = vector.broadcast %cst_25 : f32 to vector<8x128xf32>
    %72 = arith.mulf %70, %71 : vector<8x128xf32>
    %73 = vector.extract_strided_slice %37 {offsets = [1, 0, 0], sizes = [1, 8, 128], strides = [1, 1, 1]} : vector<4x8x128xf32> to vector<1x8x128xf32>
    %74 = vector.shape_cast %73 : vector<1x8x128xf32> to vector<8x128xf32>
    %75 = arith.addf %74, %28 : vector<8x128xf32>
    %cst_26 = arith.constant 0.142857149 : f32
    %76 = vector.broadcast %cst_26 : f32 to vector<8x128xf32>
    %77 = arith.mulf %75, %76 : vector<8x128xf32>
    %78 = vector.extract_strided_slice %37 {offsets = [2, 0, 0], sizes = [1, 8, 128], strides = [1, 1, 1]} : vector<4x8x128xf32> to vector<1x8x128xf32>
    %79 = vector.shape_cast %78 : vector<1x8x128xf32> to vector<8x128xf32>
    %cst_27 = arith.constant 5.000000e-01 : f32
    %80 = vector.broadcast %cst_27 : f32 to vector<8x128xf32>
    %81 = arith.mulf %80, %79 : vector<8x128xf32>
    %82 = vector.extract_strided_slice %37 {offsets = [3, 0, 0], sizes = [1, 8, 128], strides = [1, 1, 1]} : vector<4x8x128xf32> to vector<1x8x128xf32>
    %83 = vector.shape_cast %82 : vector<1x8x128xf32> to vector<8x128xf32>
    %cst_28 = arith.constant 5.000000e-01 : f32
    %84 = vector.broadcast %cst_28 : f32 to vector<8x128xf32>
    %85 = arith.mulf %84, %83 : vector<8x128xf32>
    %86 = arith.subf %72, %81 : vector<8x128xf32>
    %87 = arith.subf %77, %85 : vector<8x128xf32>
    %88 = arith.addf %72, %81 : vector<8x128xf32>
    %89 = arith.addf %77, %85 : vector<8x128xf32>
    %90 = vector.extract_strided_slice %38 {offsets = [0, 0, 0], sizes = [1, 8, 128], strides = [1, 1, 1]} : vector<4x8x128xf32> to vector<1x8x128xf32>
    %91 = vector.shape_cast %90 : vector<1x8x128xf32> to vector<8x128xf32>
    %92 = arith.addf %91, %27 : vector<8x128xf32>
    %cst_29 = arith.constant 0.142857149 : f32
    %93 = vector.broadcast %cst_29 : f32 to vector<8x128xf32>
    %94 = arith.mulf %92, %93 : vector<8x128xf32>
    %95 = vector.extract_strided_slice %38 {offsets = [1, 0, 0], sizes = [1, 8, 128], strides = [1, 1, 1]} : vector<4x8x128xf32> to vector<1x8x128xf32>
    %96 = vector.shape_cast %95 : vector<1x8x128xf32> to vector<8x128xf32>
    %97 = arith.addf %96, %28 : vector<8x128xf32>
    %cst_30 = arith.constant 0.142857149 : f32
    %98 = vector.broadcast %cst_30 : f32 to vector<8x128xf32>
    %99 = arith.mulf %97, %98 : vector<8x128xf32>
    %100 = vector.extract_strided_slice %38 {offsets = [2, 0, 0], sizes = [1, 8, 128], strides = [1, 1, 1]} : vector<4x8x128xf32> to vector<1x8x128xf32>
    %101 = vector.shape_cast %100 : vector<1x8x128xf32> to vector<8x128xf32>
    %cst_31 = arith.constant 5.000000e-01 : f32
    %102 = vector.broadcast %cst_31 : f32 to vector<8x128xf32>
    %103 = arith.mulf %102, %101 : vector<8x128xf32>
    %104 = vector.extract_strided_slice %38 {offsets = [3, 0, 0], sizes = [1, 8, 128], strides = [1, 1, 1]} : vector<4x8x128xf32> to vector<1x8x128xf32>
    %105 = vector.shape_cast %104 : vector<1x8x128xf32> to vector<8x128xf32>
    %cst_32 = arith.constant 5.000000e-01 : f32
    %106 = vector.broadcast %cst_32 : f32 to vector<8x128xf32>
    %107 = arith.mulf %106, %105 : vector<8x128xf32>
    %108 = arith.subf %94, %103 : vector<8x128xf32>
    %109 = arith.subf %99, %107 : vector<8x128xf32>
    %110 = arith.addf %94, %103 : vector<8x128xf32>
    %111 = arith.addf %99, %107 : vector<8x128xf32>
    %112 = arith.minimumf %66, %110 : vector<8x128xf32>
    %113 = arith.maximumf %64, %108 : vector<8x128xf32>
    %114 = arith.subf %112, %113 : vector<8x128xf32>
    %cst_33 = arith.constant 0.000000e+00 : f32
    %115 = vector.broadcast %cst_33 : f32 to vector<8x128xf32>
    %116 = arith.maximumf %114, %115 : vector<8x128xf32>
    %117 = arith.minimumf %67, %111 : vector<8x128xf32>
    %118 = arith.maximumf %65, %109 : vector<8x128xf32>
    %119 = arith.subf %117, %118 : vector<8x128xf32>
    %cst_34 = arith.constant 0.000000e+00 : f32
    %120 = vector.broadcast %cst_34 : f32 to vector<8x128xf32>
    %121 = arith.maximumf %119, %120 : vector<8x128xf32>
    %122 = arith.mulf %116, %121 : vector<8x128xf32>
    %123 = arith.subf %66, %64 : vector<8x128xf32>
    %124 = arith.subf %67, %65 : vector<8x128xf32>
    %125 = arith.mulf %123, %124 : vector<8x128xf32>
    %126 = arith.subf %110, %108 : vector<8x128xf32>
    %127 = arith.subf %111, %109 : vector<8x128xf32>
    %128 = arith.mulf %126, %127 : vector<8x128xf32>
    %129 = arith.addf %125, %128 : vector<8x128xf32>
    %130 = arith.subf %129, %122 : vector<8x128xf32>
    %131 = arith.minimumf %88, %110 : vector<8x128xf32>
    %132 = arith.maximumf %86, %108 : vector<8x128xf32>
    %133 = arith.subf %131, %132 : vector<8x128xf32>
    %cst_35 = arith.constant 0.000000e+00 : f32
    %134 = vector.broadcast %cst_35 : f32 to vector<8x128xf32>
    %135 = arith.maximumf %133, %134 : vector<8x128xf32>
    %136 = arith.minimumf %89, %111 : vector<8x128xf32>
    %137 = arith.maximumf %87, %109 : vector<8x128xf32>
    %138 = arith.subf %136, %137 : vector<8x128xf32>
    %cst_36 = arith.constant 0.000000e+00 : f32
    %139 = vector.broadcast %cst_36 : f32 to vector<8x128xf32>
    %140 = arith.maximumf %138, %139 : vector<8x128xf32>
    %141 = arith.mulf %135, %140 : vector<8x128xf32>
    %142 = arith.subf %88, %86 : vector<8x128xf32>
    %143 = arith.subf %89, %87 : vector<8x128xf32>
    %144 = arith.mulf %142, %143 : vector<8x128xf32>
    %145 = arith.subf %110, %108 : vector<8x128xf32>
    %146 = arith.subf %111, %109 : vector<8x128xf32>
    %147 = arith.mulf %145, %146 : vector<8x128xf32>
    %148 = arith.addf %144, %147 : vector<8x128xf32>
    %149 = arith.subf %148, %141 : vector<8x128xf32>
    %cst_37 = arith.constant 0.000000e+00 : f32
    %150 = vector.broadcast %cst_37 : f32 to vector<8x128xf32>
    %151 = arith.cmpf ogt, %122, %150 : vector<8x128xf32>
    %152 = tpu.reciprocal %130 {approx = true} : vector<8x128xf32> -> vector<8x128xf32>
    %153 = arith.mulf %122, %152 : vector<8x128xf32>
    %cst_38 = arith.constant 0.000000e+00 : f32
    %154 = vector.broadcast %cst_38 : f32 to vector<8x128xf32>
    %155 = arith.select %151, %153, %154 : vector<8x128xi1>, vector<8x128xf32>
    %cst_39 = arith.constant 0.000000e+00 : f32
    %156 = vector.broadcast %cst_39 : f32 to vector<8x128xf32>
    %157 = arith.cmpf ogt, %141, %156 : vector<8x128xf32>
    %158 = tpu.reciprocal %149 {approx = true} : vector<8x128xf32> -> vector<8x128xf32>
    %159 = arith.mulf %141, %158 : vector<8x128xf32>
    %cst_40 = arith.constant 0.000000e+00 : f32
    %160 = vector.broadcast %cst_40 : f32 to vector<8x128xf32>
    %161 = arith.select %157, %159, %160 : vector<8x128xi1>, vector<8x128xf32>
    %cst_41 = arith.constant 1.000000e+00 : f32
    %162 = vector.broadcast %cst_41 : f32 to vector<8x128xf32>
    %163 = arith.cmpf oeq, %45, %162 : vector<8x128xf32>
    %164 = arith.andi %163, %26 : vector<8x128xi1>
    %165 = arith.mulf %122, %149 : vector<8x128xf32>
    %166 = arith.mulf %141, %130 : vector<8x128xf32>
    %167 = arith.cmpf oge, %165, %166 : vector<8x128xf32>
    %168 = arith.andi %164, %167 : vector<8x128xi1>
    %cst_42 = arith.constant dense<true> : vector<8x128xi1>
    %169 = arith.xori %167, %cst_42 : vector<8x128xi1>
    %170 = arith.andi %164, %169 : vector<8x128xi1>
    %171 = vector.extract_strided_slice %36 {offsets = [0, 0, 0], sizes = [2, 8, 128], strides = [1, 1, 1]} : vector<4x8x128xf32> to vector<2x8x128xf32>
    %172 = vector.extract_strided_slice %38 {offsets = [0, 0, 0], sizes = [2, 8, 128], strides = [1, 1, 1]} : vector<4x8x128xf32> to vector<2x8x128xf32>
    %173 = arith.subf %171, %172 : vector<2x8x128xf32>
    %174 = vector.extract_strided_slice %36 {offsets = [2, 0, 0], sizes = [2, 8, 128], strides = [1, 1, 1]} : vector<4x8x128xf32> to vector<2x8x128xf32>
    %175 = math.sqrt %174 : vector<2x8x128xf32>
    %176 = vector.extract_strided_slice %38 {offsets = [2, 0, 0], sizes = [2, 8, 128], strides = [1, 1, 1]} : vector<4x8x128xf32> to vector<2x8x128xf32>
    %177 = math.sqrt %176 : vector<2x8x128xf32>
    %178 = arith.subf %175, %177 : vector<2x8x128xf32>
    %179 = arith.mulf %173, %173 : vector<2x8x128xf32>
    %180 = arith.mulf %178, %178 : vector<2x8x128xf32>
    %181 = arith.addf %179, %180 : vector<2x8x128xf32>
    %cst_43 = arith.constant dense<0.000000e+00> : vector<8x128xf32>
    %182 = vector.multi_reduction <add>, %181, %cst_43 [0] : vector<2x8x128xf32> to vector<8x128xf32>
    %cst_44 = arith.constant 5.000000e+00 : f32
    %183 = vector.broadcast %cst_44 : f32 to vector<8x128xf32>
    %184 = arith.mulf %183, %182 : vector<8x128xf32>
    %185 = vector.extract_strided_slice %37 {offsets = [0, 0, 0], sizes = [2, 8, 128], strides = [1, 1, 1]} : vector<4x8x128xf32> to vector<2x8x128xf32>
    %186 = vector.extract_strided_slice %39 {offsets = [0, 0, 0], sizes = [2, 8, 128], strides = [1, 1, 1]} : vector<4x8x128xf32> to vector<2x8x128xf32>
    %187 = arith.subf %185, %186 : vector<2x8x128xf32>
    %188 = vector.extract_strided_slice %37 {offsets = [2, 0, 0], sizes = [2, 8, 128], strides = [1, 1, 1]} : vector<4x8x128xf32> to vector<2x8x128xf32>
    %189 = math.sqrt %188 : vector<2x8x128xf32>
    %190 = vector.extract_strided_slice %39 {offsets = [2, 0, 0], sizes = [2, 8, 128], strides = [1, 1, 1]} : vector<4x8x128xf32> to vector<2x8x128xf32>
    %191 = math.sqrt %190 : vector<2x8x128xf32>
    %192 = arith.subf %189, %191 : vector<2x8x128xf32>
    %193 = arith.mulf %187, %187 : vector<2x8x128xf32>
    %194 = arith.mulf %192, %192 : vector<2x8x128xf32>
    %195 = arith.addf %193, %194 : vector<2x8x128xf32>
    %cst_45 = arith.constant dense<0.000000e+00> : vector<8x128xf32>
    %196 = vector.multi_reduction <add>, %195, %cst_45 [0] : vector<2x8x128xf32> to vector<8x128xf32>
    %cst_46 = arith.constant 5.000000e+00 : f32
    %197 = vector.broadcast %cst_46 : f32 to vector<8x128xf32>
    %198 = arith.mulf %197, %196 : vector<8x128xf32>
    %c10 = arith.constant 10 : index
    %c0_47 = arith.constant 0 : index
    %c0_48 = arith.constant 0 : index
    %199 = vector.load %arg1[%c10, %c0_47, %c0_48] : memref<14x8x128xf32, #tpu.memory_space<vmem>>, vector<4x8x128xf32>
    %c10_49 = arith.constant 10 : index
    %c0_50 = arith.constant 0 : index
    %c0_51 = arith.constant 0 : index
    %200 = vector.load %arg2[%c10_49, %c0_50, %c0_51] : memref<14x8x128xf32, #tpu.memory_space<vmem>>, vector<4x8x128xf32>
    %201 = arith.subf %199, %200 : vector<4x8x128xf32>
    %202 = arith.mulf %201, %201 : vector<4x8x128xf32>
    %cst_52 = arith.constant dense<0.000000e+00> : vector<8x128xf32>
    %203 = vector.multi_reduction <add>, %202, %cst_52 [0] : vector<4x8x128xf32> to vector<8x128xf32>
    %204 = arith.subf %41, %155 : vector<8x128xf32>
    %205 = arith.mulf %204, %204 : vector<8x128xf32>
    %206 = arith.subf %43, %161 : vector<8x128xf32>
    %207 = arith.mulf %206, %206 : vector<8x128xf32>
    %cst_53 = arith.constant 5.000000e-01 : f32
    %208 = vector.broadcast %cst_53 : f32 to vector<8x128xf32>
    %209 = arith.mulf %208, %207 : vector<8x128xf32>
    %cst_54 = arith.constant 5.000000e-01 : f32
    %210 = vector.broadcast %cst_54 : f32 to vector<8x128xf32>
    %211 = arith.mulf %210, %205 : vector<8x128xf32>
    %212 = arith.select %167, %209, %211 : vector<8x128xi1>, vector<8x128xf32>
    %213 = arith.mulf %41, %41 : vector<8x128xf32>
    %214 = arith.mulf %43, %43 : vector<8x128xf32>
    %215 = arith.addf %213, %214 : vector<8x128xf32>
    %cst_55 = arith.constant 5.000000e-01 : f32
    %216 = vector.broadcast %cst_55 : f32 to vector<8x128xf32>
    %217 = arith.mulf %216, %215 : vector<8x128xf32>
    %cst_56 = arith.constant 0.000000e+00 : f32
    %218 = vector.broadcast %cst_56 : f32 to vector<8x128xf32>
    %219 = arith.select %26, %217, %218 : vector<8x128xi1>, vector<8x128xf32>
    %220 = arith.select %164, %212, %219 : vector<8x128xi1>, vector<8x128xf32>
    %cst_57 = arith.constant 0.000000e+00 : f32
    %221 = vector.broadcast %cst_57 : f32 to vector<8x128xf32>
    %222 = arith.select %168, %184, %221 : vector<8x128xi1>, vector<8x128xf32>
    %cst_58 = arith.constant 0.000000e+00 : f32
    %223 = vector.broadcast %cst_58 : f32 to vector<8x128xf32>
    %224 = arith.select %170, %198, %223 : vector<8x128xi1>, vector<8x128xf32>
    %225 = arith.addf %222, %224 : vector<8x128xf32>
    %226 = arith.addf %225, %220 : vector<8x128xf32>
    %cst_59 = arith.constant 0.000000e+00 : f32
    %227 = vector.broadcast %cst_59 : f32 to vector<8x128xf32>
    %228 = arith.select %164, %203, %227 : vector<8x128xi1>, vector<8x128xf32>
    %229 = arith.addf %226, %228 : vector<8x128xf32>
    %cst_60 = arith.constant -1.000000e+00 : f32
    %230 = vector.broadcast %cst_60 : f32 to vector<8x128xf32>
    %231 = arith.select %168, %35, %230 : vector<8x128xi1>, vector<8x128xf32>
    %232 = vector.shape_cast %231 : vector<8x128xf32> to vector<1x8x128xf32>
    %cst_61 = arith.constant dense<0xFF800000> : vector<1xf32>
    %233 = vector.multi_reduction <maximumf>, %232, %cst_61 [1, 2] : vector<1x8x128xf32> to vector<1xf32>
    %234 = vector.shape_cast %233 : vector<1xf32> to vector<1x1x1xf32>
    %235 = vector.extract %234[0, 0, 0] : f32 from vector<1x1x1xf32>
    %cst_62 = arith.constant 0.000000e+00 : f32
    %236 = arith.cmpf oge, %235, %cst_62 : f32
    %237 = vector.broadcast %235 : f32 to vector<8x128xf32>
    %238 = arith.cmpf olt, %35, %237 : vector<8x128xf32>
    %cst_63 = arith.constant 0.000000e+00 : f32
    %239 = vector.broadcast %cst_63 : f32 to vector<8x128xf32>
    %240 = arith.select %238, %220, %239 : vector<8x128xi1>, vector<8x128xf32>
    %241 = vector.shape_cast %240 : vector<8x128xf32> to vector<1x8x128xf32>
    %cst_64 = arith.constant dense<0.000000e+00> : vector<1xf32>
    %242 = vector.multi_reduction <add>, %241, %cst_64 [1, 2] : vector<1x8x128xf32> to vector<1xf32>
    %243 = vector.shape_cast %242 : vector<1xf32> to vector<1x1x1xf32>
    %244 = vector.extract %243[0, 0, 0] : f32 from vector<1x1x1xf32>
    %245 = vector.broadcast %235 : f32 to vector<8x128xf32>
    %246 = arith.cmpf oeq, %35, %245 : vector<8x128xf32>
    %cst_65 = arith.constant 0.000000e+00 : f32
    %247 = vector.broadcast %cst_65 : f32 to vector<8x128xf32>
    %248 = arith.select %246, %205, %247 : vector<8x128xi1>, vector<8x128xf32>
    %249 = vector.shape_cast %248 : vector<8x128xf32> to vector<1x8x128xf32>
    %cst_66 = arith.constant dense<0.000000e+00> : vector<1xf32>
    %250 = vector.multi_reduction <add>, %249, %cst_66 [1, 2] : vector<1x8x128xf32> to vector<1xf32>
    %251 = vector.shape_cast %250 : vector<1xf32> to vector<1x1x1xf32>
    %252 = vector.extract %251[0, 0, 0] : f32 from vector<1x1x1xf32>
    %253 = vector.broadcast %235 : f32 to vector<8x128xf32>
    %254 = arith.cmpf ogt, %35, %253 : vector<8x128xf32>
    %255 = arith.andi %170, %254 : vector<8x128xi1>
    %cst_67 = arith.constant 0.000000e+00 : f32
    %256 = vector.broadcast %cst_67 : f32 to vector<8x128xf32>
    %257 = arith.select %255, %207, %256 : vector<8x128xi1>, vector<8x128xf32>
    %258 = vector.shape_cast %257 : vector<8x128xf32> to vector<1x8x128xf32>
    %cst_68 = arith.constant dense<0.000000e+00> : vector<1xf32>
    %259 = vector.multi_reduction <add>, %258, %cst_68 [1, 2] : vector<1x8x128xf32> to vector<1xf32>
    %260 = vector.shape_cast %259 : vector<1xf32> to vector<1x1x1xf32>
    %261 = vector.extract %260[0, 0, 0] : f32 from vector<1x1x1xf32>
    %c0_69 = arith.constant 0 : index
    %262 = memref.load %arg4[%c0_69] : memref<4xf32, #tpu.memory_space<smem>>
    %c1 = arith.constant 1 : index
    %263 = memref.load %arg4[%c1] : memref<4xf32, #tpu.memory_space<smem>>
    %c2 = arith.constant 2 : index
    %264 = memref.load %arg4[%c2] : memref<4xf32, #tpu.memory_space<smem>>
    %265 = vector.shape_cast %229 : vector<8x128xf32> to vector<1x8x128xf32>
    %cst_70 = arith.constant dense<0.000000e+00> : vector<1xf32>
    %266 = vector.multi_reduction <add>, %265, %cst_70 [1, 2] : vector<1x8x128xf32> to vector<1xf32>
    %267 = vector.shape_cast %266 : vector<1xf32> to vector<1x1x1xf32>
    %268 = vector.extract %267[0, 0, 0] : f32 from vector<1x1x1xf32>
    %269 = arith.addf %262, %268 : f32
    %270 = vector.shape_cast %220 : vector<8x128xf32> to vector<1x8x128xf32>
    %cst_71 = arith.constant dense<0.000000e+00> : vector<1xf32>
    %271 = vector.multi_reduction <add>, %270, %cst_71 [1, 2] : vector<1x8x128xf32> to vector<1xf32>
    %272 = vector.shape_cast %271 : vector<1xf32> to vector<1x1x1xf32>
    %273 = vector.extract %272[0, 0, 0] : f32 from vector<1x1x1xf32>
    %274 = arith.addf %263, %273 : f32
    %275 = arith.addf %263, %244 : f32
    %276 = arith.select %236, %275, %264 : f32
    %277 = arith.addf %276, %252 : f32
    %278 = arith.addf %277, %261 : f32
    %c0_72 = arith.constant 0 : index
    %279 = memref.load %arg4[%c0_72] : memref<4xf32, #tpu.memory_space<smem>>
    memref.store %269, %arg4[%c0_72] : memref<4xf32, #tpu.memory_space<smem>>
    %c1_73 = arith.constant 1 : index
    %280 = memref.load %arg4[%c1_73] : memref<4xf32, #tpu.memory_space<smem>>
    memref.store %274, %arg4[%c1_73] : memref<4xf32, #tpu.memory_space<smem>>
    %c2_74 = arith.constant 2 : index
    %281 = memref.load %arg4[%c2_74] : memref<4xf32, #tpu.memory_space<smem>>
    memref.store %278, %arg4[%c2_74] : memref<4xf32, #tpu.memory_space<smem>>
    %282 = arith.addf %269, %278 : f32
    %cst_75 = arith.constant 2.000000e+00 : f32
    %283 = arith.divf %282, %cst_75 : f32
    %c0_76 = arith.constant 0 : index
    %284 = memref.load %arg3[%c0_76] : memref<1xf32, #tpu.memory_space<smem>>
    memref.store %283, %arg3[%c0_76] : memref<1xf32, #tpu.memory_space<smem>>
    return
  }
  func.func @transform_0(%arg0: i32) -> (i32, i32, i32) {
    %c0_i32 = arith.constant 0 : i32
    %c0_i32_0 = arith.constant 0 : i32
    %c0_i32_1 = arith.constant 0 : i32
    return %c0_i32, %arg0, %c0_i32_0 : i32, i32, i32
  }
  func.func @transform_1(%arg0: i32) -> (i32, i32, i32) {
    %c0_i32 = arith.constant 0 : i32
    %c0_i32_0 = arith.constant 0 : i32
    %c0_i32_1 = arith.constant 0 : i32
    return %c0_i32, %arg0, %c0_i32_0 : i32, i32, i32
  }
  func.func @transform_2(%arg0: i32) -> i32 {
    %c0_i32 = arith.constant 0 : i32
    %c0_i32_0 = arith.constant 0 : i32
    return %c0_i32 : i32
  }
}

</mosaic_0001>

<bundles_post_ra>
// kernel: objloss_pallas.1
= control target key start
LH: loop header
LB: loop body
LE: loop exit
PB: predicated region body
PF: predicated region fallthrough
CT: control target
= control target key end

     0   :  { %v22_v0 = vlaneseq  ;;  %s745_s0 = inlined_call_operand.vmem [shape: f32[14,8,128], index: 0, kind: input, shape index: {}]   ;;  %s746_s1 = inlined_call_operand.vmem [shape: f32[14,8,128], index: 1, kind: input, shape index: {}]   ;;  %s747_s2 = inlined_call_operand.hbm [shape: f32[1], index: 2, kind: output, shape index: {}]  }
   0x1   :  { %v47_v3 = vld [vmem:[%s745_s0] sm:$0xff]  ;;  %v454_v4 = vld [vmem:[%s745_s0 + $0x10] sm:$0xff]  ;;  %v48_v6 = vld [vmem:[%s745_s0 + $0x8] sm:$0xff] }
   0x2   :  { %v23_v1 = vshrl.u32 %v22_v0, 7  ;;  %v28_v2 = vand.u32 127, %v22_v0  ;;  %v56_v5 = vld [vmem:[%s746_s1] sm:$0xff]  ;;  %v465_v7 = vld [vmem:[%s745_s0 + $0x18] sm:$0xff]  ;;  %v57_v8 = vld [vmem:[%s746_s1 + $0x8] sm:$0xff]  ;;  %399 = vrsqrt.f32 %v454_v4 }
   0x3   :  { %v470_v9 = vsub.f32 %v47_v3, %v56_v5  ;;  %v473_v11 = vsub.f32 %v48_v6, %v57_v8  ;;  %401 = vrsqrt.f32 %v465_v7 }
   0x4   :  { %v29_v10 = vmul.u32 128, %v23_v1 }
   0x5   :  { %7 = vsyncpa [#allocation4], 0  ;;  %v482_v14 = vld [vmem:[%s745_s0 + $0x38] sm:$0xff]  ;;  %v487_v15 = vld [vmem:[%s745_s0 + $0x40] sm:$0xff]  ;;  %v75_v21 = vmul.f32 0.5, %v454_v4  ;;  %v76_v22 = vmul.f32 0.5, %v465_v7 }
   0x6   :  { %v476_v12 = vadd.s32 %v29_v10, %v28_v2  ;;  %v492_v16 = vld [vmem:[%s746_s1 + $0x10] sm:$0xff]  ;;  %v498_v18 = vld [vmem:[%s746_s1 + $0x18] sm:$0xff]  ;;  %v509_v23 = vld [vmem:[%s745_s0 + $0x28] sm:$0xff]  ;;  %v85_v25 = vmul.f32 0.5, %v482_v14  ;;  %v86_v26 = vmul.f32 0.5, %v487_v15  ;;  %v155_v28 = vand.u32 2147483648, %v454_v4 }
   0x7   :  { %v514_v24 = vld [vmem:[%s745_s0 + $0x30] sm:$0xff]  ;;  %v95_v27 = vmul.f32 0.5, %v492_v16  ;;  %v96_v31 = vmul.f32 0.5, %v498_v18  ;;  %v162_v32 = vand.u32 2147483648, %v465_v7  ;;  %403 = vrsqrt.f32 %v492_v16  ;;  %v376_v61 = vld [vmem:[%s746_s1 + $0x20] sm:$0xff]  ;;  %s419_s16 = scalar_lea.hbm %s747_s2, 16 }
   0x8   :  { %v32_v13 = vand.u32 63, %v476_v12  ;;  %v31_v17 = vshra.s32 %v476_v12, 6  ;;  %v169_v36 = vand.u32 2147483648, %v492_v16  ;;  %vm152_vm0 = vcmp.eq.f32.partialorder %v454_v4, inf  ;;  %p420_p1 = scmp.ne.s32.totalorder %s747_s2, %s419_s16  ;;  %p423_p2 = scmp.lt.u32.totalorder %s419_s16, %s747_s2 }
   0x9   :  { %vm159_vm1 = vcmp.eq.f32.partialorder %v465_v7, inf  ;;  %405 = vrsqrt.f32 %v498_v18  ;;  %v176_v44 = vand.u32 2147483648, %v498_v18  ;;  %vm35_vm2 = vcmp.lt.s32.totalorder %v476_v12, 128 }
   0xa   :  { %v500_v19 = vshra.s32 %v32_v13, 3  ;;  %v502_v20 = vand.u32 7, %v32_v13  ;;  %v42_v34 = vmul.u32 64, %v31_v17  ;;  %vm154_vm4 = vcmp.eq.f32.partialorder %v454_v4, 0.0  ;;  %p425_p3 = pnand %p423_p2, %p420_p1 }
   0xb   :  { %vm161_vm5 = vcmp.eq.f32.partialorder %v465_v7, 0.0  ;;  %vm166_vm6 = vcmp.eq.f32.partialorder %v492_v16, inf  ;;  %vm168_vm7 = vcmp.eq.f32.partialorder %v492_v16, 0.0  ;;  %vm173_vm8 = vcmp.eq.f32.partialorder %v498_v18, inf }
   0xc   :  { %v40_v29 = vcvt.s32.f32 %v500_v19  ;;  %v41_v30 = vcvt.s32.f32 %v502_v20  ;;  %v400_v33 = vpop.eup %399  ;;  %v43_v35 = vmul.u32 8, %v502_v20  ;;  %vm36_vm3 = vcmp.lt.s32.totalorder %v500_v19, 7 }
   0xd   :  { %v402_v37 = vpop.eup %401  ;;  %v151_v48 = vmul.f32 %v400_v33, %v454_v4  ;;  %vm38_vm9 = vcmp.lt.s32.totalorder %v502_v20, 7  ;;  %vm175_vm10 = vcmp.eq.f32.partialorder %v498_v18, 0.0  ;;  %vm140_vm11 = vcmp.eq.f32.partialorder %v376_v61, 1.0  ;;  %vm37_vm12 = vmand %vm35_vm2, %vm36_vm3  ;;  %v378_v61 = vld [vmem:[%s745_s0 + $0x58] sm:$0xff] }
   0xe   :  { %v71_v38 = vadd.f32 %v47_v3, %v40_v29  ;;  %v73_v39 = vadd.f32 %v48_v6, %v41_v30  ;;  %v81_v40 = vadd.f32 %v509_v23, %v40_v29  ;;  %v83_v41 = vadd.f32 %v514_v24, %v41_v30  ;;  %vm584_vm13 = vmand %vm37_vm12, %vm38_vm9 }
   0xf   :  { %v91_v42 = vadd.f32 %v56_v5, %v40_v29  ;;  %v93_v43 = vadd.f32 %v57_v8, %v41_v30  ;;  %v158_v52 = vmul.f32 %v402_v37, %v465_v7  ;;  %v44_v53 = vadd.s32 %v43_v35, %v42_v34  ;;  %vm606_vm14 = vmand %vm140_vm11, %vm584_vm13 }
  0x10   :  { %v72_v45 = vmul.f32 0.14285715, %v71_v38  ;;  %v74_v46 = vmul.f32 0.14285715, %v73_v39  ;;  %v82_v47 = vmul.f32 0.14285715, %v81_v40  ;;  %v153_v39 = vsel %vm152_vm0, %v454_v4, %v151_v48 }
  0x11   :  { %v84_v49 = vmul.f32 0.14285715, %v83_v41  ;;  %v92_v50 = vmul.f32 0.14285715, %v91_v42  ;;  %v94_v51 = vmul.f32 0.14285715, %v93_v43  ;;  %v160_v43 = vsel %vm159_vm1, %v465_v7, %v158_v52 }
  0x12   :  { %v77_v54 = vsub.f32 %v72_v45, %v75_v21  ;;  %v78_v55 = vsub.f32 %v74_v46, %v76_v22  ;;  %v79_v56 = vadd.f32 %v75_v21, %v72_v45  ;;  %v80_v57 = vadd.f32 %v76_v22, %v74_v46  ;;  %v404_v21 = vpop.eup %403 }
  0x13   :  { %v87_v58 = vsub.f32 %v82_v47, %v85_v25  ;;  %v88_v59 = vsub.f32 %v84_v49, %v86_v26  ;;  %v89_v60 = vadd.f32 %v85_v25, %v82_v47  ;;  %v90_v62 = vadd.f32 %v86_v26, %v84_v49  ;;  %v406_v35 = vpop.eup %405 }
  0x14   :  { %v97_v63 = vsub.f32 %v92_v50, %v95_v27  ;;  %v98_v0 = vsub.f32 %v94_v51, %v96_v31  ;;  %v99_v1 = vadd.f32 %v95_v27, %v92_v50  ;;  %v100_v2 = vadd.f32 %v96_v31, %v94_v51 }
  0x15   :  { %v110_v3 = vsub.f32 %v79_v56, %v77_v54  ;;  %v111_v5 = vsub.f32 %v80_v57, %v78_v55  ;;  %v127_v6 = vsub.f32 %v89_v60, %v87_v58  ;;  %v128_v38 = vsub.f32 %v90_v62, %v88_v59 }
  0x16   :  { %v101_v8 = vmin.f32 %v79_v56, %v99_v1  ;;  %v102_v10 = vmax.f32 %v77_v54, %v97_v63  ;;  %v106_v13 = vmax.f32 %v78_v55, %v98_v0  ;;  %v113_v17 = vsub.f32 %v99_v1, %v97_v63 }
  0x17   :  { %v105_v22 = vmin.f32 %v80_v57, %v100_v2  ;;  %v112_v25 = vmul.f32 %v111_v5, %v110_v3  ;;  %v114_v29 = vsub.f32 %v100_v2, %v98_v0  ;;  %v118_v30 = vmin.f32 %v89_v60, %v99_v1 }
  0x18   :  { %v103_v26 = vsub.f32 %v101_v8, %v102_v10  ;;  %v119_v33 = vmax.f32 %v87_v58, %v97_v63  ;;  %v122_v34 = vmin.f32 %v90_v62, %v100_v2  ;;  %v123_v27 = vmax.f32 %v88_v59, %v98_v0  ;;  %v373_v8 = vld [vmem:[%s746_s1 + $0x40] sm:$0xff] }
  0x19   :  { %v107_v37 = vsub.f32 %v105_v22, %v106_v13  ;;  %v115_v31 = vmul.f32 %v114_v29, %v113_v17  ;;  %v129_v47 = vmul.f32 %v128_v38, %v127_v6  ;;  %v165_v49 = vmul.f32 %v404_v21, %v492_v16  ;;  %v372_v6 = vld [vmem:[%s746_s1 + $0x38] sm:$0xff] }
  0x1a   :  { %v104_v40 = vmax.f32 %v103_v26, 0.0  ;;  %v120_v41 = vsub.f32 %v118_v30, %v119_v33  ;;  %v124_v42 = vsub.f32 %v122_v34, %v123_v27  ;;  %v156_v48 = vsel %vm154_vm4, %v155_v28, %v153_v39  ;;  %v370_v27 = vld [vmem:[%s746_s1 + $0x28] sm:$0xff] }
  0x1b   :  { %v108_v45 = vmax.f32 %v107_v37, 0.0  ;;  %v116_v46 = vadd.f32 %v115_v31, %v112_v25  ;;  %v172_v54 = vmul.f32 %v406_v35, %v498_v18  ;;  %v130_v55 = vadd.f32 %v129_v47, %v115_v31  ;;  %v371_v35 = vld [vmem:[%s746_s1 + $0x30] sm:$0xff] }
  0x1c   :  { %v121_v50 = vmax.f32 %v120_v41, 0.0  ;;  %v125_v51 = vmax.f32 %v124_v42, 0.0  ;;  %v163_v56 = vsel %vm161_vm5, %v162_v32, %v160_v43  ;;  %v167_v12 = vsel %vm166_vm6, %v492_v16, %v165_v49 }
  0x1d   :  { %v563_v52 = vmul.f32 %v108_v45, %v104_v40  ;;  %v45_v57 = vadd.s32 %v44_v53, %v500_v19  ;;  %v170_v4 = vsel %vm168_vm7, %v169_v36, %v167_v12  ;;  %v174_v28 = vsel %vm173_vm8, %v498_v18, %v172_v54 }
  0x1e   :  { %v573_v58 = vmul.f32 %v125_v51, %v121_v50  ;;  %v177_v19 = vsel %vm175_vm10, %v176_v44, %v174_v28  ;;  %v178_v53 = vsub.f32 %v156_v48, %v170_v4  ;;  %v180_v16 = vmul.f32 %v470_v9, %v470_v9 }
  0x1f   :  { %v117_v32 = vsub.f32 %v116_v46, %v563_v52  ;;  %v179_v59 = vsub.f32 %v163_v56, %v177_v19  ;;  %v181_v20 = vmul.f32 %v473_v11, %v473_v11  ;;  %v601_v63 = vcvt.s32.f32 %v45_v57 }
  0x20   :  { %v131_v36 = vsub.f32 %v130_v55, %v573_v58  ;;  %v182_v62 = vmul.f32 %v178_v53, %v178_v53  ;;  %vm192_vm1 = vcmp.eq.f32.partialorder %v482_v14, inf  ;;  %v195_v25 = vand.u32 2147483648, %v482_v14 }
  0x21   :  { %v599_v60 = vmul.f32 %v573_v58, %v117_v32  ;;  %v183_v44 = vmul.f32 %v179_v59, %v179_v59  ;;  %407 = vrcp.f32 %v117_v32  ;;  %vm199_vm2 = vcmp.eq.f32.partialorder %v487_v15, inf }
  0x22   :  { %v611_v9 = vmul.f32 %v131_v36, %v563_v52  ;;  %v184_v0 = vadd.f32 %v182_v62, %v180_v16  ;;  %409 = vrsqrt.f32 %v482_v14  ;;  %vm194_vm3 = vcmp.eq.f32.partialorder %v482_v14, 0.0 }
  0x23   :  { %v185_v11 = vadd.f32 %v183_v44, %v181_v20  ;;  %411 = vrsqrt.f32 %v487_v15  ;;  %vm201_vm4 = vcmp.eq.f32.partialorder %v487_v15, 0.0  ;;  %v202_v33 = vand.u32 2147483648, %v487_v15 }
  0x24   :  { %vm144_vm15 = vcmp.ge.f32.partialorder %v611_v9, %v599_v60  ;;  %413 = vrsqrt.f32 %v372_v6  ;;  %vm206_vm5 = vcmp.eq.f32.partialorder %v372_v6, inf  ;;  %v189_v39 = vsub.f32 %v514_v24, %v371_v35  ;;  %v375_v24 = vld [vmem:[%s745_s0 + $0x48] sm:$0xff] }
  0x25   :  { %vm620_vm0 = vmand %vm606_vm14, %vm144_vm15  ;;  %v186_v1 = vadd.f32 %v185_v11, %v184_v0  ;;  %415 = vrcp.f32 %v131_v36  ;;  %vm208_vm6 = vcmp.eq.f32.partialorder %v372_v6, 0.0  ;;  %v209_v45 = vand.u32 2147483648, %v372_v6 }
  0x26   :  { %v268_v2 = vsel %vm620_vm0, %v601_v63, -1.0  ;;  %417 = vrsqrt.f32 %v373_v8  ;;  %vm132_vm7 = vcmp.gt.f32.partialorder %v563_v52, 0.0  ;;  %vm136_vm8 = vcmp.gt.f32.partialorder %v573_v58, 0.0 }
  0x27   :  { %269 = vmax.xlane.f32.xlu0 %v268_v2  ;;  %v627_v3 = vmul.f32 5.0, %v186_v1  ;;  %vm213_vm9 = vcmp.eq.f32.partialorder %v373_v8, inf  ;;  %vm215_vm10 = vcmp.eq.f32.partialorder %v373_v8, 0.0  ;;  %v216_v54 = vand.u32 2147483648, %v373_v8 }
  0x28   :  { %v221_v28 = vmul.f32 %v189_v39, %v189_v39  ;;  %vm431_vm11 = vmmov 1  }
  0x29   :  { %v262_v5 = vsel %vm620_vm0, %v627_v3, 0.0  ;;  %vm671_vm12 = vmxor %vm144_vm15, %vm431_vm11  ;;  %v381_v3 = vld [vmem:[%s746_s1 + $0x50] sm:$0xff] }
  0x2b   :  { %v408_v10 = vpop.eup %407 }
  0x2c   :  { %v410_v13 = vpop.eup %409  ;;  %v134_v41 = vmul.f32 %v408_v10, %v563_v52 }
  0x2d   :  { %v412_v17 = vpop.eup %411  ;;  %v191_v21 = vmul.f32 %v410_v13, %v482_v14 }
  0x2e   :  { %v414_v22 = vpop.eup %413  ;;  %v198_v29 = vmul.f32 %v412_v17, %v487_v15 }
  0x2f   :  { %v416_v30 = vpop.eup %415  ;;  %v193_v26 = vsel %vm192_vm1, %v482_v14, %v191_v21  ;;  %v205_v38 = vmul.f32 %v414_v22, %v372_v6  ;;  %v188_v14 = vsub.f32 %v509_v23, %v370_v27  ;;  %v135_v23 = vsel %vm132_vm7, %v134_v41, 0.0  ;;  %vm147_vm1 = vmand %vm606_vm14, %vm671_vm12  ;;  %v383_v27 = vld [vmem:[%s746_s1 + $0x60] sm:$0xff] }
  0x30   :  { %v418_v34 = vpop.eup %417  ;;  %v196_v37 = vsel %vm194_vm3, %v195_v25, %v193_v26  ;;  %v200_v31 = vsel %vm199_vm2, %v487_v15, %v198_v29  ;;  %v138_v42 = vmul.f32 %v416_v30, %v573_v58  ;;  %v374_v15 = vld [vmem:[%s745_s0 + $0x20] sm:$0xff]  ;;  %v257_v58 = vmul.f32 %v375_v24, %v375_v24  ;;  %v377_v30 = vld [vmem:[%s745_s0 + $0x50] sm:$0xff] }
  0x31   :  { %v203_v40 = vsel %vm201_vm4, %v202_v33, %v200_v31  ;;  %v207_v43 = vsel %vm206_vm5, %v372_v6, %v205_v38  ;;  %v212_v46 = vmul.f32 %v418_v34, %v373_v8  ;;  %v249_v50 = vsub.f32 %v374_v15, %v135_v23  ;;  %v379_v34 = vld [vmem:[%s745_s0 + $0x60] sm:$0xff]  ;;  %v380_v38 = vld [vmem:[%s745_s0 + $0x68] sm:$0xff] }
  0x32   :  { %v139_v47 = vsel %vm136_vm8, %v138_v42, 0.0  ;;  %v210_v49 = vsel %vm208_vm6, %v209_v45, %v207_v43  ;;  %v256_v51 = vmul.f32 %v374_v15, %v374_v15  ;;  %v220_v55 = vmul.f32 %v188_v14, %v188_v14  ;;  %v384_v14 = vld [vmem:[%s746_s1 + $0x68] sm:$0xff] }
  0x33   :  { %v214_v48 = vsel %vm213_vm9, %v373_v8, %v212_v46  ;;  %v218_v52 = vsub.f32 %v196_v37, %v210_v49  ;;  %v251_v56 = vsub.f32 %v375_v24, %v139_v47  ;;  %v250_v12 = vmul.f32 %v249_v50, %v249_v50 }
  0x34   :  { %v217_v57 = vsel %vm215_vm10, %v216_v54, %v214_v48  ;;  %v258_v16 = vadd.f32 %v257_v58, %v256_v51  ;;  %v238_v26 = vsub.f32 %v377_v30, %v381_v3  ;;  %v240_v35 = vsub.f32 %v379_v34, %v383_v27 }
  0x35   :  { %v219_v4 = vsub.f32 %v203_v40, %v217_v57  ;;  %v222_v32 = vmul.f32 %v218_v52, %v218_v52  ;;  %v252_v19 = vmul.f32 %v251_v56, %v251_v56  ;;  %v254_v53 = vmul.f32 0.5, %v250_v12 }
  0x36   :  { %v259_v62 = vmul.f32 0.5, %v258_v16  ;;  %v242_v37 = vmul.f32 %v238_v26, %v238_v26  ;;  %v241_v39 = vsub.f32 %v380_v38, %v384_v14  ;;  %v244_v40 = vmul.f32 %v240_v35, %v240_v35 }
  0x37   :  { %v223_v36 = vmul.f32 %v219_v4, %v219_v4  ;;  %v224_v59 = vadd.f32 %v222_v32, %v220_v55  ;;  %v253_v20 = vmul.f32 0.5, %v252_v19 }
  0x38   :  { %v260_v2 = vsel %vm584_vm13, %v259_v62, 0.0  ;;  %v245_v42 = vmul.f32 %v241_v39, %v241_v39 }
  0x39   :  { %v225_v0 = vadd.f32 %v223_v36, %v221_v28  ;;  %v255_v11 = vsel %vm144_vm15, %v253_v20, %v254_v53 }
  0x3a   :  { %v261_v8 = vsel %vm606_vm14, %v255_v11, %v260_v2 }
  0x3b   :  { %v226_v1 = vadd.f32 %v225_v0, %v224_v59 }
  0x3d   :  { %v227_v6 = vmul.f32 5.0, %v226_v1 }
  0x3f   :  { %v263_v60 = vsel %vm147_vm1, %v227_v6, 0.0 }
  0x40   :  { %v264_v9 = vadd.f32 %v263_v60, %v262_v5  ;;  %v382_v5 = vld [vmem:[%s746_s1 + $0x58] sm:$0xff] }
  0x41   :  { %v239_v33 = vsub.f32 %v378_v61, %v382_v5 }
  0x42   :  { %v265_v10 = vadd.f32 %v264_v9, %v261_v8 }
  0x43   :  { %v243_v31 = vmul.f32 %v239_v33, %v239_v33 }
  0x45   :  { %v246_v41 = vadd.f32 %v243_v31, %v242_v37 }
  0x47   :  { %v247_v43 = vadd.f32 %v246_v41, %v244_v40 }
  0x49   :  { %v248_v45 = vadd.f32 %v247_v43, %v245_v42 }
  0x4b   :  { %v266_v15 = vsel %vm606_vm14, %v248_v45, 0.0 }
  0x4c   :  { %v267_v47 = vadd.f32 %v266_v15, %v265_v10 }
  0xb4   :  { %v270_v13 = vpop.xlane.xlu0 %269 }
  0xb5   :  { %v271_v17 = vrot.slane %v270_v13, 4 }
  0xb7   :  { %v272_v7 = vmax.f32 %v270_v13, %v271_v17 }
  0xb9   :  { %v273_v21 = vrot.slane %v272_v7, 2 }
  0xbb   :  { %v274_v22 = vmax.f32 %v272_v7, %v273_v21 }
  0xbd   :  { %v275_v25 = vrot.slane %v274_v22, 1 }
  0xbf   :  { %v276_v29 = vmax.f32 %v274_v22, %v275_v25 }
  0xc1   :  { %387 = vpush %v276_v29 }
  0xf2   :  { %s719_s7 = spop %387 }
  0xf3   :  { %v279_v46 = vstv %s719_s7  ;;  %p278_p0 = scmp.ge.f32.partialorder %s719_s7, 0.0 }
  0xf4   :  { %vm291_vm13 = vcmp.eq.f32.partialorder %v601_v63, %v279_v46  ;;  %vm280_vm15 = vcmp.lt.f32.partialorder %v601_v63, %v279_v46  ;;  %vm302_vm0 = vcmp.gt.f32.partialorder %v601_v63, %v279_v46 }
  0xf5   :  { %v292_v23 = vsel %vm291_vm13, %v250_v12, 0.0  ;;  %v281_v24 = vsel %vm280_vm15, %v261_v8, 0.0  ;;  %vm303_vm2 = vmand %vm147_vm1, %vm302_vm0 }
  0xf6   :  { %293 = vadd.xlane.f32.xlu1 %v292_v23  ;;  %282 = vadd.xlane.f32.xlu0 %v281_v24  ;;  %v304_v49 = vsel %vm303_vm2, %v252_v19, 0.0 }
  0xfa   :  { %305 = vadd.xlane.f32.xlu1 %v304_v49  ;;  %317 = vadd.xlane.f32.xlu0 %v267_v47 }
 0x183   :  { %v294_v50 = vpop.xlane.xlu1 %293  ;;  %v283_v51 = vpop.xlane.xlu0 %282 }
 0x184   :  { %v295_v48 = vrot.slane %v294_v50, 4  ;;  %v284_v54 = vrot.slane %v283_v51, 4 }
 0x186   :  { %v296_v52 = vadd.f32 %v295_v48, %v294_v50  ;;  %v285_v63 = vadd.f32 %v284_v54, %v283_v51 }
 0x187   :  { %v306_v55 = vpop.xlane.xlu1 %305  ;;  %v318_v56 = vpop.xlane.xlu0 %317 }
 0x188   :  { %v297_v12 = vrot.slane %v296_v52, 2  ;;  %v286_v57 = vrot.slane %v285_v63, 2  ;;  %v307_v58 = vrot.slane %v306_v55, 4  ;;  %v319_v18 = vrot.slane %v318_v56, 4 }
 0x18a   :  { %v308_v4 = vadd.f32 %v307_v58, %v306_v55  ;;  %v320_v28 = vadd.f32 %v319_v18, %v318_v56  ;;  %v287_v32 = vadd.f32 %v286_v57, %v285_v63  ;;  %v298_v53 = vadd.f32 %v297_v12, %v296_v52 }
 0x18c   :  { %v309_v16 = vrot.slane %v308_v4, 2  ;;  %v321_v19 = vrot.slane %v320_v28, 2  ;;  %v288_v36 = vrot.slane %v287_v32, 1  ;;  %v299_v59 = vrot.slane %v298_v53, 1 }
 0x18e   :  { %v310_v20 = vadd.f32 %v309_v16, %v308_v4  ;;  %v322_v62 = vadd.f32 %v321_v19, %v320_v28  ;;  %v289_v44 = vadd.f32 %v288_v36, %v287_v32  ;;  %v300_v0 = vadd.f32 %v299_v59, %v298_v53 }
 0x190   :  { %389 = vpush %v289_v44  ;;  %v311_v11 = vrot.slane %v310_v20, 1  ;;  %v323_v1 = vrot.slane %v322_v62, 1 }
 0x191   :  { %391 = vpush %v300_v0 }
 0x192   :  { %v312_v2 = vadd.f32 %v311_v11, %v310_v20  ;;  %v324_v6 = vadd.f32 %v323_v1, %v322_v62 }
 0x194   :  { %393 = vpush %v312_v2 }
 0x195   :  { %395 = vpush %v324_v6 }
 0x1c1   :  { %s390_s0 = spop %389 }
 0x1c2   :  { %s757_s0 = smov (!%p278_p0, %s390_s0), 0.0  ;;  %s392_s1 = spop %391 }
 0x1c3   :  { %s339_s8 = sadd.f32 %s392_s1, %s757_s0 }
 0x1c5   :  { %s394_s9 = spop %393 }
 0x1c6   :  { %s340_s10 = sadd.f32 %s394_s9, %s339_s8  ;;  %s396_s11 = spop %395 }
 0x1c8   :  { %s347_s12 = sadd.f32 %s396_s11, %s340_s10 }
 0x1ca   :  { %s350_s13 = smul.f32 0.5, %s347_s12 }
 0x1cc   :  { %352 = sst [smem:[#allocation3]] %s350_s13 }
 0x1cd   :  { %428 = shalt.err (!%p425_p3)
}
 0x1ce   :  { %s432_s21 = smov [#allocation3]  }
 0x1cf   :  { %360 = dma.smem_to_hbm %s432_s21, 16, %s747_s2, [#allocation4]  }
 0x1d0   :  { %429 = dma.done.wait [#allocation4], 16  }
 0x1d1   :  { %430 = vsyncadd [#allocation4], 4294967280 }
 0x1d2   :  { %364 = sfence }
 0x1d3   :  { %365 = vsyncpa [#allocation4], 1 }

</bundles_post_ra>
